<compile_context>
chip_gen: v5e
topology: v5e:2x2
jax: 0.10.0
libtpu: 0.0.40
codegen_flags: <defaults>
</compile_context>

<pallas_src>
import jax
import jax.numpy as jnp
from jax.experimental import pallas as pl
from jax.experimental.pallas import tpu as pltpu

_LANE = 128
_SUBLANE = 8


def _round_up(x, m):
    return ((x + m - 1) // m) * m


def _classification_kernel(x_ref, w_ref, b_ref, o_ref):
    # Linear layer on the MXU: [TB, H] f32 @ [H, O] f32 -> [TB, O] f32.
    logits = jnp.dot(
        x_ref[...], w_ref[...], preferred_element_type=jnp.float32
    ) + b_ref[...]
    # Numerically-stable softmax over dim=1 (out_channels), exact divide.
    m = jnp.max(logits, axis=1, keepdims=True)
    e = jnp.exp(logits - m)
    s = jnp.sum(e, axis=1, keepdims=True)
    # NOTE: on a partial last batch tile the padded rows may hold garbage and can
    # produce inf/NaN here; softmax is row-local and the masked writeback drops
    # those rows, so valid outputs are unaffected.
    o_ref[...] = (e / s).astype(o_ref.dtype)


def _vmem_footprint_bytes(tile_b, H, O):
    """Conservative double-buffered VMEM footprint of one grid step, f32, with
    lane/sublane padding of every block."""
    in_tile = tile_b * _round_up(H, _LANE) * 4
    out_tile = tile_b * _round_up(O, _LANE) * 4
    w_tile = _round_up(H, _SUBLANE) * _round_up(O, _LANE) * 4
    b_tile = _SUBLANE * _round_up(O, _LANE) * 4
    return 2 * (in_tile + out_tile + w_tile + b_tile)


def _pick_tile_b(B, H, O, budget_bytes=24 << 20):
    """Largest power-of-two batch tile whose double-buffered footprint stays under
    `budget_bytes` (leaves ample headroom below v7x's 64 MiB physical VMEM and the
    32 MiB v6e/v7x scoped default; vmem_limit_bytes is still set explicitly so
    v5e's 16 MiB default does not bind). Big tiles (>= ~1 MiB payload per grid
    step) amortize the ~0.35 us/step pipeline overhead."""
    tile = 16384
    while tile > 512 and _vmem_footprint_bytes(tile, H, O) > budget_bytes:
        tile //= 2
    if B <= tile:
        return B  # single full-batch block (full-dim block shape is always legal)
    return tile   # multiple of 8; last grid block may be partial (rows masked)


@jax.jit
def classification_forward(embeds, weight_t, bias):
    """embeds: [B, H] f32, weight_t: [H, O] f32, bias: [1, O] f32 -> [B, O] f32."""
    B, H = embeds.shape
    O = weight_t.shape[1]

    tile_b = _pick_tile_b(B, H, O)
    grid = (pl.cdiv(B, tile_b),)

    vmem_limit = int(min(_vmem_footprint_bytes(tile_b, H, O) + (2 << 20), 48 << 20))

    # f32 inputs are fed straight through: no wrapper-side cast, so the dominant
    # embeds HBM stream is read exactly once by the kernel's pipelined DMA.
    return pl.pallas_call(
        _classification_kernel,
        out_shape=jax.ShapeDtypeStruct((B, O), jnp.float32),
        grid_spec=pltpu.PrefetchScalarGridSpec(
            num_scalar_prefetch=0,
            grid=grid,
            in_specs=[
                pl.BlockSpec((tile_b, H), lambda i: (i, 0)),  # streamed batch tile
                pl.BlockSpec((H, O), lambda i: (0, 0)),       # VMEM-resident weight
                pl.BlockSpec((1, O), lambda i: (0, 0)),       # VMEM-resident bias
            ],
            out_specs=pl.BlockSpec((tile_b, O), lambda i: (i, 0)),
        ),
        compiler_params=pltpu.CompilerParams(
            # Independent batch tiles: lets v7x shard the grid across its 2 TCs;
            # measured-neutral on v5e/v6e.
            dimension_semantics=("parallel",),
            # Explicit limit so the enlarged tile also compiles under v5e's 16 MiB
            # default scoped-VMEM limit while staying well below v7x's 64 MiB.
            vmem_limit_bytes=vmem_limit,
        ),
    )(embeds, weight_t, bias)


def init_classification_params(key, hidden_channels, out_channels):
    """Deterministic init mirroring the PyTorch module.

    PyTorch Linear weight has shape [out, hidden]; init_params applies
    xavier_uniform_ to it (2-D param). Bias (1-D) keeps PyTorch's default
    Linear init: U(-1/sqrt(fan_in), 1/sqrt(fan_in)).
    We store the weight transposed as [hidden, out] for the kernel.
    """
    kw, kb = jax.random.split(key)
    fan_in, fan_out = hidden_channels, out_channels
    xavier_bound = (6.0 / (fan_in + fan_out)) ** 0.5
    weight_t = jax.random.uniform(
        kw, (hidden_channels, out_channels), jnp.float32,
        minval=-xavier_bound, maxval=xavier_bound,
    )
    bias_bound = 1.0 / (fan_in ** 0.5)
    bias = jax.random.uniform(
        kb, (1, out_channels), jnp.float32,
        minval=-bias_bound, maxval=bias_bound,
    )
    return weight_t, bias


def _reference(embeds, weight_t, bias):
    logits = jnp.dot(embeds, weight_t, precision=jax.lax.Precision.HIGHEST) + bias
    return jax.nn.softmax(logits, axis=1)


if __name__ == "__main__":
    key = jax.random.PRNGKey(0)
    k_x, k_p, k_big = jax.random.split(key, 3)

    hidden_channels = 32
    out_channels = 4
    weight_t, bias = init_classification_params(k_p, hidden_channels, out_channels)

    # Small demo shape consistent with the module: batch=8, hidden=32, out=4.
    batch = 8
    embeds = jax.random.normal(k_x, (batch, hidden_channels), jnp.float32)
    y = classification_forward(embeds, weight_t, bias)
    jax.block_until_ready(y)

    ref = _reference(embeds, weight_t, bias)
    assert y.shape == (batch, out_channels)
    assert jnp.allclose(y, ref, atol=1e-3, rtol=1e-3), (y, ref)
    assert jnp.allclose(jnp.sum(y, axis=1), 1.0, atol=1e-5)

    # Larger batch exercising the streamed multi-tile path (grid of 8192-row tiles
    # plus a partial last tile) against the same reference.
    big_batch = 2 * 8192 + 100
    embeds_big = jax.random.normal(k_big, (big_batch, hidden_channels), jnp.float32)
    y_big = classification_forward(embeds_big, weight_t, bias)
    jax.block_until_ready(y_big)

    ref_big = _reference(embeds_big, weight_t, bias)
    assert y_big.shape == (big_batch, out_channels)
    assert jnp.allclose(y_big, ref_big, atol=1e-3, rtol=1e-3)
    assert jnp.allclose(jnp.sum(y_big, axis=1), 1.0, atol=1e-5)

    print("KERNEL_OK")
</pallas_src>

<mosaic_0001>
module attributes {stable_mosaic.version = 11 : i64} {
  func.func @_classification_kernel(%arg0: i32, %arg1: memref<8x32xf32, #tpu.memory_space<vmem>>, %arg2: memref<32x4xf32, #tpu.memory_space<vmem>>, %arg3: memref<1x4xf32, #tpu.memory_space<vmem>>, %arg4: memref<8x4xf32, #tpu.memory_space<vmem>>) attributes {dimension_semantics = [#tpu.dimension_semantics<parallel>], iteration_bounds = array<i64: 1>, scalar_prefetch = 0 : i64, scratch_operands = 0 : i64, tpu.core_type = #tpu.core_type<tc>, window_params = [{transform_indices = @transform_0, window_bounds = array<i64: 8, 32>}, {pipeline_mode = #tpu.pipeline_mode<synchronous>, transform_indices = @transform_1, window_bounds = array<i64: 32, 4>}, {pipeline_mode = #tpu.pipeline_mode<synchronous>, transform_indices = @transform_2, window_bounds = array<i64: 1, 4>}, {transform_indices = @transform_3, window_bounds = array<i64: 8, 4>}]} {
    %c0 = arith.constant 0 : index
    %c0_0 = arith.constant 0 : index
    %0 = vector.load %arg1[%c0, %c0_0] : memref<8x32xf32, #tpu.memory_space<vmem>>, vector<8x32xf32>
    %c0_1 = arith.constant 0 : index
    %c0_2 = arith.constant 0 : index
    %1 = vector.load %arg2[%c0_1, %c0_2] : memref<32x4xf32, #tpu.memory_space<vmem>>, vector<32x4xf32>
    %cst = arith.constant dense<0.000000e+00> : vector<8x4xf32>
    %2 = tpu.matmul %0, %1, %cst {dimension_numbers = #tpu.dot_dimension_numbers<[1], [0], [0], [1], [0, 0, 1, 1], [], []>} : vector<8x32xf32>, vector<32x4xf32>, vector<8x4xf32> -> vector<8x4xf32>
    %c0_3 = arith.constant 0 : index
    %c0_4 = arith.constant 0 : index
    %3 = vector.load %arg3[%c0_3, %c0_4] : memref<1x4xf32, #tpu.memory_space<vmem>>, vector<1x4xf32>
    %4 = vector.broadcast %3 : vector<1x4xf32> to vector<8x4xf32>
    %5 = arith.addf %2, %4 : vector<8x4xf32>
    %cst_5 = arith.constant dense<0xFF800000> : vector<8xf32>
    %6 = vector.multi_reduction <maximumf>, %5, %cst_5 [1] : vector<8x4xf32> to vector<8xf32>
    %7 = vector.shape_cast %6 : vector<8xf32> to vector<8x1xf32>
    %8 = vector.broadcast %7 : vector<8x1xf32> to vector<8x4xf32>
    %9 = arith.subf %5, %8 : vector<8x4xf32>
    %10 = math.exp %9 : vector<8x4xf32>
    %cst_6 = arith.constant dense<0.000000e+00> : vector<8xf32>
    %11 = vector.multi_reduction <add>, %10, %cst_6 [1] : vector<8x4xf32> to vector<8xf32>
    %12 = vector.shape_cast %11 : vector<8xf32> to vector<8x1xf32>
    %13 = vector.broadcast %12 : vector<8x1xf32> to vector<8x4xf32>
    %14 = arith.divf %10, %13 : vector<8x4xf32>
    %c0_7 = arith.constant 0 : index
    %c0_8 = arith.constant 0 : index
    %15 = vector.load %arg4[%c0_7, %c0_8] : memref<8x4xf32, #tpu.memory_space<vmem>>, vector<8x4xf32>
    tpu.vector_store %arg4[%c0_7, %c0_8], %14 {strides = array<i32>} : memref<8x4xf32, #tpu.memory_space<vmem>>, vector<8x4xf32>,
    return
  }
  func.func @transform_0(%arg0: i32) -> (i32, i32) {
    %c0_i32 = arith.constant 0 : i32
    %c0_i32_0 = arith.constant 0 : i32
    return %arg0, %c0_i32 : i32, i32
  }
  func.func @transform_1(%arg0: i32) -> (i32, i32) {
    %c0_i32 = arith.constant 0 : i32
    %c0_i32_0 = arith.constant 0 : i32
    %c0_i32_1 = arith.constant 0 : i32
    return %c0_i32, %c0_i32_0 : i32, i32
  }
  func.func @transform_2(%arg0: i32) -> (i32, i32) {
    %c0_i32 = arith.constant 0 : i32
    %c0_i32_0 = arith.constant 0 : i32
    %c0_i32_1 = arith.constant 0 : i32
    return %c0_i32, %c0_i32_0 : i32, i32
  }
  func.func @transform_3(%arg0: i32) -> (i32, i32) {
    %c0_i32 = arith.constant 0 : i32
    %c0_i32_0 = arith.constant 0 : i32
    return %arg0, %c0_i32 : i32, i32
  }
}

</mosaic_0001>

<bundles_post_ra>
// kernel: classification_forward.1
= control target key start
LH: loop header
LB: loop body
LE: loop exit
PB: predicated region body
PF: predicated region fallthrough
CT: control target
= control target key end

     0   :  { %vm23_vm0 = vcmask 261120   ;;  %vm47_vm1 = vcmask 31744   ;;  %s127_s1 = inlined_call_operand.vmem [shape: f32[32,4], index: 1, kind: input, shape index: {}]   ;;  %s128_s2 = inlined_call_operand.vmem [shape: f32[1,4], index: 2, kind: input, shape index: {}]   ;;  %s129_s0 = inlined_call_operand.vmem [shape: f32[8,32], index: 0, kind: input, shape index: {}]   ;;  %s130_s3 = inlined_call_operand.vmem [shape: f32[8,4], index: 3, kind: output, shape index: {}]  }
   0x1   :  { %v18_v0 = vld [vmem:[%s127_s1 + $0x18] sm:$0xff]  ;;  %v17_v1 = vld [vmem:[%s127_s1 + $0x10] sm:$0xff]  ;;  %v16_v2 = vld [vmem:[%s127_s1 + $0x8] sm:$0xff] }
   0x2   :  { %39 = vmatpush.msra.mxu0 %v18_v0  ;;  %v15_v3 = vld [vmem:[%s127_s1] sm:$0xff] }
   0x3   :  { %v14_v4 = vld [vmem:[%s129_s0] sm:$0xff] }
   0x4   :  { %40 = vmatpush.msra.mxu0 %v17_v1  ;;  %v78_v5 = vld [vmem:[%s128_s2] ss:$0 sm:$0xff] }
   0x6   :  { %41 = vmatpush.msra.mxu0 %v16_v2 }
   0x8   :  { %42 = vmatpush.msra.mxu0 %v15_v3 }
   0x9   :  { %77 = vmatmul.msk.f32.vlgmr.msra.gmra.mxu0 %vm23_vm0, %v14_v4 }
  0x86   :  { %v44_v6 = vpop.f32.mrf.mxu0 }
  0x87   :  { %v45_v7 = vadd.f32 %v78_v5, %v44_v6 }
  0x89   :  { %v48_v8 = vsel %vm47_vm1, %v45_v7, -inf }
  0x8a   :  { %49 = vmax.xlane.f32.xlu0 %v48_v8 }
  0xfd   :  { %v50_v9 = vpop.xlane.xlu0 %49 }
  0xfe   :  { %v51_v10 = vsub.f32 %v45_v7, %v50_v9 }
 0x100   :  { %v52_v11 = vmul.f32 1.442695, %v51_v10 }
 0x102   :  { %79 = vpow2.f32 %v52_v11 }
 0x108   :  { %v80_v12 = vpop.eup %79 }
 0x109   :  { %v54_v13 = vsel %vm47_vm1, %v80_v12, 0.0 }
 0x10a   :  { %55 = vadd.xlane.f32.xlu0 %v54_v13 }
 0x17d   :  { %v56_v14 = vpop.xlane.xlu0 %55 }
 0x17e   :  { %81 = vrcp.f32 %v56_v14  ;;  %v68_v18 = vand.u32 2147483648, %v56_v14  ;;  %v66_v20 = vand.u32 2147483647, %v56_v14  ;;  %vm62_vm3 = vweird.f32 %v56_v14 }
 0x180   :  { %v69_v22 = vor.u32 1.1754944e-38, %v68_v18  ;;  %vm67_vm5 = vcmp.eq.f32.partialorder %v66_v20, 8.507059e+37 }
 0x184   :  { %v82_v15 = vpop.eup %81 }
 0x185   :  { %v58_v16 = vmul.f32 %v82_v15, %v56_v14  ;;  %vm63_vm2 = vweird.f32 %v82_v15 }
 0x186   :  { %vm64_vm4 = vmor %vm62_vm3, %vm63_vm2 }
 0x187   :  { %v59_v17 = vsub.f32 1.0, %v58_v16 }
 0x189   :  { %v60_v19 = vmul.f32 %v82_v15, %v59_v17 }
 0x18b   :  { %v61_v21 = vadd.f32 %v82_v15, %v60_v19 }
 0x18d   :  { %v65_v23 = vsel %vm64_vm4, %v82_v15, %v61_v21 }
 0x18e   :  { %v70_v24 = vsel %vm67_vm5, %v69_v22, %v65_v23 }
 0x18f   :  { %v71_v25 = vmul.f32 %v80_v12, %v70_v24 }
 0x191   :  { %72 = vst.msk [vmem:[%s130_s3] sm:$0xff] %vm47_vm1, %v71_v25 }

</bundles_post_ra>
